<compile_context>
chip_gen: v6e
topology: v6e:2x2x1
jax: 0.10.0
libtpu: 0.0.40
codegen_flags: <defaults>
</compile_context>

<pallas_src>
import jax
import jax.numpy as jnp
from jax.experimental import pallas as pl
from jax.experimental.pallas import tpu as pltpu

# -------------------- model dimensions (small, synthetic) --------------------
N, C, H, W = 2, 4, 16, 16      # batch, channels, spatial
D_VISUAL = 32                  # backbone feature width (d_visual)
NUM_CLASSES = 8                # args.num_classes
D_TEXTUAL = D_VISUAL           # textual embedding width (VAE treated as identity)

# packed lane-dense output slab layout: [preds | ranks | visual_feats | pad]
LANES = 128                    # lane-dense last dim (multiple of 128)
ROWS = 8                       # sublane granule (N=2 padded up to 8 rows)
_PREDS_OFF = 0
_RANKS_OFF = NUM_CLASSES
_VIS_OFF = 2 * NUM_CLASSES


def _vmem_spec():
    return pl.BlockSpec(memory_space=pltpu.MemorySpace.VMEM)


# ----------------------------- fused forward kernel --------------------------
# TODO(synk): the reference uses a pretrained torchvision CNN (fc/classifier
# replaced by nn.Identity); the full pretrained backbone is not reproduced.
# The stand-in keeps the hot path (global-avg pool + matmul + ReLU) on-chip.
def zsl_fused_kernel(x_ref, wb_ref, bb_ref, wc_ref, bc_ref, lab_ref, txt_ref,
                     slab_ref, loss_ref):
    # --- stand-in vision backbone: GAP + Linear + ReLU -> visual_feats -------
    x = x_ref[...]                                        # [N, C, H*W]
    pooled = jnp.sum(x, axis=-1) * (1.0 / x.shape[-1])    # [N, C]
    vis = jnp.dot(pooled, wb_ref[...],
                  preferred_element_type=jnp.float32) + bb_ref[...]
    vis = jnp.maximum(vis, 0.0)                           # [N, D_VISUAL]

    # --- classifier = Linear + Sigmoid; BCELoss(mean) -------------------------
    logits = jnp.dot(vis, wc_ref[...],
                     preferred_element_type=jnp.float32) + bc_ref[...]
    preds = jax.nn.sigmoid(logits)                        # [N, NUM_CLASSES]
    y = lab_ref[...]
    # torch.nn.BCELoss clamps log terms at -100
    log_p = jnp.maximum(jnp.log(preds), -100.0)
    log_1mp = jnp.maximum(jnp.log(1.0 - preds), -100.0)
    loss_ref[0, 0] = jnp.mean(-(y * log_p + (1.0 - y) * log_1mp))   # scalar -> SMEM

    # --- sim_score(visual_feats, textual_embeddings) (ranking path `ranks`) ---
    # matches ZSLNet.sim_score: a / ||a||, b / (1e-6 + ||b||), a_n @ b_n.T
    # (no eps on `a`, same as the PyTorch reference)
    t = txt_ref[...]                                      # [NUM_CLASSES, D_TEXTUAL]
    a_n = vis * jax.lax.rsqrt(jnp.sum(vis * vis, axis=1, keepdims=True))
    b_inv = pl.reciprocal(
        1e-6 + jnp.sqrt(jnp.sum(t * t, axis=1, keepdims=True)), approx=True)
    b_n = t * b_inv
    ranks = jax.lax.dot_general(
        a_n, b_n, dimension_numbers=(((1,), (1,)), ((), ())),
        preferred_element_type=jnp.float32)               # [N, NUM_CLASSES]

    # --- lane-dense packed output slab (single full-tile HBM store) ----------
    n = preds.shape[0]
    slab_ref[...] = jnp.zeros_like(slab_ref)
    slab_ref[0:n, _PREDS_OFF:_PREDS_OFF + NUM_CLASSES] = preds
    slab_ref[0:n, _RANKS_OFF:_RANKS_OFF + NUM_CLASSES] = ranks
    slab_ref[0:n, _VIS_OFF:_VIS_OFF + D_VISUAL] = vis


# ------------------------------ forward wrapper -------------------------------
def zsl_forward(x_nchw, labels, params, textual_embeddings):
    n, c, h, w = x_nchw.shape
    x_flat = x_nchw.reshape(n, c, h * w)      # one wrapper-side reshape, metadata only
    slab, loss = pl.pallas_call(
        zsl_fused_kernel,
        out_shape=(jax.ShapeDtypeStruct((ROWS, LANES), jnp.float32),   # packed slab
                   jax.ShapeDtypeStruct((1, 1), jnp.float32)),         # scalar BCE
        in_specs=[_vmem_spec()] * 7,
        out_specs=(_vmem_spec(),
                   pl.BlockSpec(memory_space=pltpu.MemorySpace.SMEM)),
    )(x_flat, params["w_back"], params["b_back"],
      params["w_cls"], params["b_cls"], labels, textual_embeddings)
    preds = slab[:n, _PREDS_OFF:_PREDS_OFF + NUM_CLASSES]
    ranks = slab[:n, _RANKS_OFF:_RANKS_OFF + NUM_CLASSES]
    visual_feats = slab[:n, _VIS_OFF:_VIS_OFF + D_VISUAL]
    return preds, loss, ranks, visual_feats


if __name__ == "__main__":
    key = jax.random.PRNGKey(0)
    k1, k2, k3, k4, k5 = jax.random.split(key, 5)

    # deterministic synthetic inputs and parameters
    x = jax.random.normal(k1, (N, C, H, W), jnp.float32)
    labels = (jax.random.uniform(k2, (N, NUM_CLASSES)) > 0.5).astype(jnp.float32)

    params = {
        "w_back": 0.1 * jax.random.normal(k3, (C, D_VISUAL), jnp.float32),
        "b_back": jnp.zeros((1, D_VISUAL), jnp.float32),
        "w_cls": 0.1 * jax.random.normal(k4, (D_VISUAL, NUM_CLASSES), jnp.float32),
        "b_cls": jnp.zeros((1, NUM_CLASSES), jnp.float32),
    }
    textual_embeddings = jax.random.normal(k5, (NUM_CLASSES, D_TEXTUAL), jnp.float32)

    forward = jax.jit(zsl_forward)

    # bce_only branch (preds, bce loss, loss string) -- args.bce_only = True
    # ranking branch's `ranks` output (cosine similarity to class embeddings).
    # TODO(synk): VAE.embeddings / CosineLoss / RankingLoss are not defined in
    # the reference source; VAE is treated as identity and those losses omitted.
    preds, loss_bce, ranks, visual_feats = forward(x, labels, params,
                                                   textual_embeddings)

    jax.block_until_ready((preds, loss_bce, ranks, visual_feats))
    _ = f"bce:\t {float(loss_bce[0, 0]):0.4f}"   # mirrors the returned log string
    assert preds.shape == (N, NUM_CLASSES)
    assert ranks.shape == (N, NUM_CLASSES)
    assert visual_feats.shape == (N, D_VISUAL)
    print("KERNEL_OK")
</pallas_src>

<mosaic_0001>
module attributes {stable_mosaic.version = 11 : i64} {
  func.func @zsl_fused_kernel(%arg0: memref<2x4x256xf32, #tpu.memory_space<vmem>>, %arg1: memref<4x32xf32, #tpu.memory_space<vmem>>, %arg2: memref<1x32xf32, #tpu.memory_space<vmem>>, %arg3: memref<32x8xf32, #tpu.memory_space<vmem>>, %arg4: memref<1x8xf32, #tpu.memory_space<vmem>>, %arg5: memref<2x8xf32, #tpu.memory_space<vmem>>, %arg6: memref<8x32xf32, #tpu.memory_space<vmem>>, %arg7: memref<8x128xf32, #tpu.memory_space<vmem>>, %arg8: memref<1x1xf32, #tpu.memory_space<smem>>) attributes {dimension_semantics = [], scalar_prefetch = 0 : i64, scratch_operands = 0 : i64, tpu.core_type = #tpu.core_type<tc>} {
    %c0 = arith.constant 0 : index
    %c0_0 = arith.constant 0 : index
    %c0_1 = arith.constant 0 : index
    %0 = vector.load %arg0[%c0, %c0_0, %c0_1] : memref<2x4x256xf32, #tpu.memory_space<vmem>>, vector<2x4x256xf32>
    %cst = arith.constant dense<0.000000e+00> : vector<2x4xf32>
    %1 = vector.multi_reduction <add>, %0, %cst [2] : vector<2x4x256xf32> to vector<2x4xf32>
    %cst_2 = arith.constant 3.906250e-03 : f32
    %2 = vector.broadcast %cst_2 : f32 to vector<2x4xf32>
    %3 = arith.mulf %1, %2 : vector<2x4xf32>
    %c0_3 = arith.constant 0 : index
    %c0_4 = arith.constant 0 : index
    %4 = vector.load %arg1[%c0_3, %c0_4] : memref<4x32xf32, #tpu.memory_space<vmem>>, vector<4x32xf32>
    %cst_5 = arith.constant dense<0.000000e+00> : vector<2x32xf32>
    %5 = tpu.matmul %3, %4, %cst_5 {dimension_numbers = #tpu.dot_dimension_numbers<[1], [0], [0], [1], [0, 0, 1, 1], [], []>} : vector<2x4xf32>, vector<4x32xf32>, vector<2x32xf32> -> vector<2x32xf32>
    %c0_6 = arith.constant 0 : index
    %c0_7 = arith.constant 0 : index
    %6 = vector.load %arg2[%c0_6, %c0_7] : memref<1x32xf32, #tpu.memory_space<vmem>>, vector<1x32xf32>
    %7 = vector.broadcast %6 : vector<1x32xf32> to vector<2x32xf32>
    %8 = arith.addf %5, %7 : vector<2x32xf32>
    %cst_8 = arith.constant 0.000000e+00 : f32
    %9 = vector.broadcast %cst_8 : f32 to vector<2x32xf32>
    %10 = arith.maximumf %8, %9 : vector<2x32xf32>
    %c0_9 = arith.constant 0 : index
    %c0_10 = arith.constant 0 : index
    %11 = vector.load %arg3[%c0_9, %c0_10] : memref<32x8xf32, #tpu.memory_space<vmem>>, vector<32x8xf32>
    %cst_11 = arith.constant dense<0.000000e+00> : vector<2x8xf32>
    %12 = tpu.matmul %10, %11, %cst_11 {dimension_numbers = #tpu.dot_dimension_numbers<[1], [0], [0], [1], [0, 0, 1, 1], [], []>} : vector<2x32xf32>, vector<32x8xf32>, vector<2x8xf32> -> vector<2x8xf32>
    %c0_12 = arith.constant 0 : index
    %c0_13 = arith.constant 0 : index
    %13 = vector.load %arg4[%c0_12, %c0_13] : memref<1x8xf32, #tpu.memory_space<vmem>>, vector<1x8xf32>
    %14 = vector.broadcast %13 : vector<1x8xf32> to vector<2x8xf32>
    %15 = arith.addf %12, %14 : vector<2x8xf32>
    %16 = arith.negf %15 : vector<2x8xf32>
    %17 = math.exp %16 : vector<2x8xf32>
    %cst_14 = arith.constant 1.000000e+00 : f32
    %18 = vector.broadcast %cst_14 : f32 to vector<2x8xf32>
    %19 = arith.addf %18, %17 : vector<2x8xf32>
    %20 = arith.divf %18, %19 : vector<2x8xf32>
    %c0_15 = arith.constant 0 : index
    %c0_16 = arith.constant 0 : index
    %21 = vector.load %arg5[%c0_15, %c0_16] : memref<2x8xf32, #tpu.memory_space<vmem>>, vector<2x8xf32>
    %22 = math.log %20 : vector<2x8xf32>
    %cst_17 = arith.constant -1.000000e+02 : f32
    %23 = vector.broadcast %cst_17 : f32 to vector<2x8xf32>
    %24 = arith.maximumf %22, %23 : vector<2x8xf32>
    %cst_18 = arith.constant 1.000000e+00 : f32
    %25 = vector.broadcast %cst_18 : f32 to vector<2x8xf32>
    %26 = arith.subf %25, %20 : vector<2x8xf32>
    %27 = math.log %26 : vector<2x8xf32>
    %cst_19 = arith.constant -1.000000e+02 : f32
    %28 = vector.broadcast %cst_19 : f32 to vector<2x8xf32>
    %29 = arith.maximumf %27, %28 : vector<2x8xf32>
    %30 = arith.mulf %21, %24 : vector<2x8xf32>
    %cst_20 = arith.constant 1.000000e+00 : f32
    %31 = vector.broadcast %cst_20 : f32 to vector<2x8xf32>
    %32 = arith.subf %31, %21 : vector<2x8xf32>
    %33 = arith.mulf %32, %29 : vector<2x8xf32>
    %34 = arith.addf %30, %33 : vector<2x8xf32>
    %cst_21 = arith.constant 0.000000e+00 : f32
    %35 = vector.broadcast %cst_21 : f32 to vector<2x8xf32>
    %36 = arith.subf %35, %34 : vector<2x8xf32>
    %37 = vector.shape_cast %36 : vector<2x8xf32> to vector<1x2x8xf32>
    %cst_22 = arith.constant dense<0.000000e+00> : vector<1xf32>
    %38 = vector.multi_reduction <add>, %37, %cst_22 [1, 2] : vector<1x2x8xf32> to vector<1xf32>
    %39 = vector.shape_cast %38 : vector<1xf32> to vector<1x1x1xf32>
    %40 = vector.extract %39[0, 0, 0] : f32 from vector<1x1x1xf32>
    %cst_23 = arith.constant 1.600000e+01 : f32
    %41 = arith.divf %40, %cst_23 : f32
    %c0_24 = arith.constant 0 : index
    %c0_25 = arith.constant 0 : index
    %42 = memref.load %arg8[%c0_24, %c0_25] : memref<1x1xf32, #tpu.memory_space<smem>>
    memref.store %41, %arg8[%c0_24, %c0_25] : memref<1x1xf32, #tpu.memory_space<smem>>
    %c0_26 = arith.constant 0 : index
    %c0_27 = arith.constant 0 : index
    %43 = vector.load %arg6[%c0_26, %c0_27] : memref<8x32xf32, #tpu.memory_space<vmem>>, vector<8x32xf32>
    %44 = arith.mulf %10, %10 : vector<2x32xf32>
    %cst_28 = arith.constant dense<0.000000e+00> : vector<2xf32>
    %45 = vector.multi_reduction <add>, %44, %cst_28 [1] : vector<2x32xf32> to vector<2xf32>
    %46 = vector.shape_cast %45 : vector<2xf32> to vector<2x1xf32>
    %47 = math.rsqrt %46 : vector<2x1xf32>
    %48 = vector.broadcast %47 : vector<2x1xf32> to vector<2x32xf32>
    %49 = arith.mulf %10, %48 : vector<2x32xf32>
    %50 = arith.mulf %43, %43 : vector<8x32xf32>
    %cst_29 = arith.constant dense<0.000000e+00> : vector<8xf32>
    %51 = vector.multi_reduction <add>, %50, %cst_29 [1] : vector<8x32xf32> to vector<8xf32>
    %52 = vector.shape_cast %51 : vector<8xf32> to vector<8x1xf32>
    %53 = math.sqrt %52 : vector<8x1xf32>
    %cst_30 = arith.constant 9.99999997E-7 : f32
    %54 = vector.broadcast %cst_30 : f32 to vector<8x1xf32>
    %55 = arith.addf %54, %53 : vector<8x1xf32>
    %56 = tpu.reciprocal %55 {approx = true} : vector<8x1xf32> -> vector<8x1xf32>
    %57 = vector.broadcast %56 : vector<8x1xf32> to vector<8x32xf32>
    %58 = arith.mulf %43, %57 : vector<8x32xf32>
    %cst_31 = arith.constant dense<0.000000e+00> : vector<2x8xf32>
    %59 = tpu.matmul %49, %58, %cst_31 {dimension_numbers = #tpu.dot_dimension_numbers<[1], [1], [0], [0], [0, 0, 1, 0], [], []>} : vector<2x32xf32>, vector<8x32xf32>, vector<2x8xf32> -> vector<2x8xf32>
    %cst_32 = arith.constant 0.000000e+00 : f32
    %60 = vector.broadcast %cst_32 : f32 to vector<8x128xf32>
    %c0_33 = arith.constant 0 : index
    %c0_34 = arith.constant 0 : index
    %61 = vector.load %arg7[%c0_33, %c0_34] : memref<8x128xf32, #tpu.memory_space<vmem>>, vector<8x128xf32>
    tpu.vector_store %arg7[%c0_33, %c0_34], %60 {strides = array<i32>} : memref<8x128xf32, #tpu.memory_space<vmem>>, vector<8x128xf32>,
    %c0_35 = arith.constant 0 : index
    %c0_36 = arith.constant 0 : index
    %62 = vector.load %arg7[%c0_35, %c0_36] : memref<8x128xf32, #tpu.memory_space<vmem>>, vector<2x8xf32>
    tpu.vector_store %arg7[%c0_35, %c0_36], %20 {strides = array<i32>} : memref<8x128xf32, #tpu.memory_space<vmem>>, vector<2x8xf32>,
    %c0_37 = arith.constant 0 : index
    %c8 = arith.constant 8 : index
    %63 = vector.load %arg7[%c0_37, %c8] : memref<8x128xf32, #tpu.memory_space<vmem>>, vector<2x8xf32>
    tpu.vector_store %arg7[%c0_37, %c8], %59 {strides = array<i32>} : memref<8x128xf32, #tpu.memory_space<vmem>>, vector<2x8xf32>,
    %c0_38 = arith.constant 0 : index
    %c16 = arith.constant 16 : index
    %64 = vector.load %arg7[%c0_38, %c16] : memref<8x128xf32, #tpu.memory_space<vmem>>, vector<2x32xf32>
    tpu.vector_store %arg7[%c0_38, %c16], %10 {strides = array<i32>} : memref<8x128xf32, #tpu.memory_space<vmem>>, vector<2x32xf32>,
    return
  }
}

</mosaic_0001>

<bundles_post_ra>
// kernel: zsl_forward.1
= control target key start
LH: loop header
LB: loop body
LE: loop exit
PB: predicated region body
PF: predicated region fallthrough
CT: control target
= control target key end

     0   :  { %vm37_vm0 = vcmask 1043456   ;;  %s580_s0 = inlined_call_operand.vmem [shape: f32[2,4,256], index: 0, kind: input, shape index: {}]   ;;  %s581_s1 = inlined_call_operand.vmem [shape: f32[4,32], index: 1, kind: input, shape index: {}]   ;;  %s582_s2 = inlined_call_operand.vmem [shape: f32[1,32], index: 2, kind: input, shape index: {}]   ;;  %s583_s3 = inlined_call_operand.vmem [shape: f32[32,8], index: 3, kind: input, shape index: {}]   ;;  %s584_s4 = inlined_call_operand.vmem [shape: f32[1,8], index: 4, kind: input, shape index: {}]   ;;  %s585_s5 = inlined_call_operand.vmem [shape: f32[2,8], index: 5, kind: input, shape index: {}]   ;;  %s586_s6 = inlined_call_operand.vmem [shape: f32[8,32], index: 6, kind: input, shape index: {}]   ;;  %s587_s7 = inlined_call_operand.vmem [shape: f32[8,128], index: 7, kind: output, shape index: {0}]   ;;  %s588_s8 = inlined_call_operand.hbm [shape: f32[1,1], index: 8, kind: output, shape index: {1}]  }
   0x1   :  { %v29_v0 = vld [vmem:[%s580_s0] sm:$0xff]  ;;  %v30_v1 = vld [vmem:[%s580_s0 + $0x8] sm:$0xff] }
   0x2   :  { %14 = vsyncpa [#allocation3], 0  ;;  %v33_v2 = vcombine.high %v29_v0, %v29_v0  ;;  %v38_v3 = vsel %vm37_vm0, %v29_v0, 0.0  ;;  %v34_v4 = vcombine.high %v30_v1, %v30_v1  ;;  %v43_v6 = vsel %vm37_vm0, %v30_v1, 0.0  ;;  %v50_v10 = vld [vmem:[%s581_s1] sm:$0xf] }
   0x3   :  { %v468_v11 = vmov 0.0   ;;  %vm469_vm1 = vmmov 0   ;;  %vm160_vm2 = vcmask 261120   ;;  %v269_v12 = vld [vmem:[%s586_s6] sm:$0xff]  ;;  %v152_v13 = vld [vmem:[%s583_s3 + $0x18] sm:$0xff]  ;;  %v60_v16 = vlaneseq  ;;  %v151_v27 = vld [vmem:[%s583_s3 + $0x10] sm:$0xff] }
   0x4   :  { %v39_v5 = vsel %vm37_vm0, %v33_v2, 0.0  ;;  %v44_v7 = vsel %vm37_vm0, %v34_v4, 0.0  ;;  %414 = vmatprep.subr.mxu0 %v468_v11  ;;  %367 = vst [vmem:[%s587_s7] sm:$0xff] %v468_v11  ;;  %416 = vmatprep.mubr.msk.f32.mxu0 %vm469_vm1, %v468_v11  ;;  %v277_v14 = vmul.f32 %v269_v12, %v269_v12  ;;  %vm70_vm3 = vcmask 1041409   ;;  %v150_v28 = vld [vmem:[%s583_s3 + $0x8] sm:$0xff]  ;;  %v149_v29 = vld [vmem:[%s583_s3] sm:$0xff]  ;;  %s470_s25 = smov 16  }
   0x5   :  { %v40_v8 = vadd.f32 %v39_v5, %v38_v3  ;;  %v45_v9 = vadd.f32 %v44_v7, %v43_v6  ;;  %415 = vmatpush3.msk.msra.mxu0 %vm37_vm0, %v50_v10  ;;  %419 = vmatprep.subr.mxu1 %v468_v11  ;;  %v61_v17 = vand.u32 127, %v60_v16  ;;  %v63_v18 = vshrl.u32 %v60_v16, 7  ;;  %v397_v39 = vld [vmem:[%s582_s2] ss:$0 sm:$0xff]  ;;  %s471_s26 = smov 8   ;;  %s472_s28 = smov [#allocation2]  }
   0x6   :  { %427 = vmatprep.mubr.msk.f32.mxu1 %vm469_vm1, %v468_v11  ;;  %430 = vmatprep.subr.mxu0 %v468_v11  ;;  %v278_v15 = vsel %vm160_vm2, %v277_v14, 0.0  ;;  %vm72_vm4 = vcmask 31744   ;;  %vm271_vm7 = vcmask 254976   ;;  %v400_v49 = vld [vmem:[%s584_s4] ss:$0 sm:$0xff]  ;;  %vm253_vm8 = vcmask 58368  }
   0x7   :  { %41 = vadd.xlane.f32.xlu0 %v40_v8  ;;  %420 = vmatpush3.msra.mxu1 %v152_v13  ;;  %v64_v20 = vsub.s32 %v61_v17, %v63_v18  ;;  %v240_v59 = vld [vmem:[%s585_s5] sm:$0x3]  ;;  %vm373_vm9 = vcmask 123968   ;;  %vm378_vm10 = vcmask 386176  }
   0x8   :  { %421 = vmatprep.subr.mxu1 %v468_v11  ;;  %279 = vadd.xlane.f32.xlu1 %v278_v15  ;;  %v249_v0 = vsub.f32 1.0, %v240_v59 }
   0x9   :  { %422 = vmatpush3.msra.mxu1 %v151_v27 }
   0xa   :  { %423 = vmatprep.subr.mxu1 %v468_v11 }
   0xb   :  { %46 = vadd.xlane.f32.xlu0 %v45_v9  ;;  %424 = vmatpush3.msra.mxu1 %v150_v28 }
   0xc   :  { %425 = vmatprep.subr.mxu1 %v468_v11 }
   0xd   :  { %426 = vmatpush3.msra.mxu1 %v149_v29 }
  0x90   :  { %v42_v19 = vpop.xlane.xlu0 %41 }
  0x91   :  { %v48_v21 = vmul.f32 0.00390625, %v42_v19  ;;  %v280_v30 = vpop.xlane.xlu1 %279 }
  0x92   :  { %444 = vrsqrt.f32 %v280_v30  ;;  %vm283_vm5 = vcmp.eq.f32.partialorder %v280_v30, inf  ;;  %v286_v32 = vand.u32 2147483648, %v280_v30  ;;  %vm285_vm6 = vcmp.eq.f32.partialorder %v280_v30, 0.0 }
  0x93   :  { %v65_v24 = vrot.slane %v48_v21, %v64_v20 }
  0x94   :  { %v47_v22 = vpop.xlane.xlu0 %46 }
  0x95   :  { %v49_v23 = vmul.f32 0.00390625, %v47_v22 }
  0x97   :  { %v69_v25 = vrot.slane %v49_v23, %v64_v20 }
  0x99   :  { %v71_v26 = vsel %vm70_vm3, %v69_v25, %v65_v24 }
  0x9a   :  { %417 = vmatmul.mubr.msk.f32.vlgmr.msra.gmra.mxu0 %vm72_vm4, %v71_v26 }
  0x9b   :  { %432 = vmatprep.mubr.msk.f32.mxu0 %vm469_vm1, %v468_v11 }
  0x9f   :  { %v445_v31 = vpop.eup %444 }
  0xa0   :  { %v282_v33 = vmul.f32 %v445_v31, %v280_v30 }
  0xa2   :  { %v284_v34 = vsel %vm283_vm5, %v280_v30, %v282_v33 }
  0xa3   :  { %v287_v35 = vsel %vm285_vm6, %v286_v32, %v284_v34 }
  0xa4   :  { %v288_v36 = vadd.f32 1e-06, %v287_v35 }
  0xa6   :  { %446 = vrcp.f32 %v288_v36 }
  0xb3   :  { %v447_v37 = vpop.eup %446 }
  0xb4   :  { %v290_v38 = vmul.f32 %v447_v37, %v269_v12 }
  0xb6   :  { %431 = vmatpush3.xpose.msk.msra.mxu0 %vm160_vm2, %v290_v38 }
 0x15a   :  { %v144_v40 = vpop.f32.mrf.mxu0 }
 0x15b   :  { %v145_v41 = vadd.f32 %v397_v39, %v144_v40 }
 0x15c   :  { %v418_v42 = vpop.f32.mrf.mxu0 }
 0x15d   :  { %v148_v43 = vmax.f32 %v145_v41, 0.0 }
 0x15f   :  { %428 = vmatmul.mubr.msk.f32.vlgmr.msra.gmra.mxu1 %vm160_vm2, %v148_v43  ;;  %v270_v44 = vmul.f32 %v148_v43, %v148_v43 }
 0x161   :  { %v272_v45 = vsel %vm271_vm7, %v270_v44, 0.0 }
 0x162   :  { %273 = vadd.xlane.f32.xlu1 %v272_v45 }
 0x1eb   :  { %v274_v46 = vpop.xlane.xlu1 %273 }
 0x1ec   :  { %448 = vrsqrt.f32 %v274_v46 }
 0x1f9   :  { %v449_v47 = vpop.eup %448 }
 0x1fa   :  { %v276_v48 = vmul.f32 %v449_v47, %v148_v43 }
 0x1fc   :  { %433 = vmatmul.mubr.msk.f32.vlgmr.msra.gmra.mxu0 %vm160_vm2, %v276_v48 }
 0x21f   :  { %v230_v50 = vpop.f32.mrf.mxu1 }
 0x220   :  { %v231_v51 = vadd.f32 %v400_v49, %v230_v50 }
 0x221   :  { %v429_v52 = vpop.f32.mrf.mxu1 }
 0x222   :  { %v402_v53 = vmul.f32 -1.442695, %v231_v51 }
 0x224   :  { %450 = vpow2.f32 %v402_v53 }
 0x231   :  { %v451_v54 = vpop.eup %450 }
 0x232   :  { %v237_v55 = vadd.f32 1.0, %v451_v54 }
 0x234   :  { %452 = vrcp.f32 %v237_v55 }
 0x241   :  { %v453_v56 = vpop.eup %452 }
 0x242   :  { %454 = vlog2.f32 %v453_v56  ;;  %v244_v57 = vsub.f32 1.0, %v453_v56  ;;  %368 = vst.msk [vmem:[%s587_s7] sm:$0x3] %vm253_vm8, %v453_v56 }
 0x244   :  { %456 = vlog2.f32 %v244_v57 }
 0x24f   :  { %v455_v58 = vpop.eup %454 }
 0x250   :  { %v242_v60 = vmul.f32 0.6931472, %v455_v58 }
 0x251   :  { %v457_v61 = vpop.eup %456 }
 0x252   :  { %v243_v62 = vmax.f32 %v242_v60, -100.0  ;;  %v246_v63 = vmul.f32 0.6931472, %v457_v61 }
 0x254   :  { %v247_v1 = vmax.f32 %v246_v63, -100.0  ;;  %v248_v2 = vmul.f32 %v243_v62, %v240_v59 }
 0x256   :  { %v250_v3 = vmul.f32 %v249_v0, %v247_v1 }
 0x258   :  { %v251_v4 = vadd.f32 %v250_v3, %v248_v2 }
 0x25a   :  { %v252_v5 = vsub.f32 0.0, %v251_v4 }
 0x25c   :  { %v254_v6 = vsel %vm253_vm8, %v252_v5, 0.0 }
 0x25d   :  { %255 = vadd.xlane.f32.xlu0 %v254_v6 }
 0x273   :  { %375 = vrot.lane.b32.xlu0 %v148_v43, %s470_s25 }
 0x2bc   :  { %v363_v7 = vpop.f32.mrf.mxu0 }
 0x2bd   :  { %370 = vrot.lane.b32.xlu1 %v363_v7, %s471_s26 }
 0x2be   :  { %v434_v8 = vpop.f32.mrf.mxu0 }
 0x2e6   :  { %v256_v9 = vpop.xlane.xlu0 %255 }
 0x2e7   :  { %v257_v10 = vrot.slane %v256_v9, 4 }
 0x2e9   :  { %v258_v11 = vadd.f32 %v257_v10, %v256_v9 }
 0x2ea   :  { %v376_v17 = vpop.permute.xlu0 %375 }
 0x2eb   :  { %v259_v12 = vrot.slane %v258_v11, 2 }
 0x2ed   :  { %v260_v13 = vadd.f32 %v259_v12, %v258_v11 }
 0x2ef   :  { %v261_v14 = vrot.slane %v260_v13, 1 }
 0x2f1   :  { %v262_v15 = vadd.f32 %v261_v14, %v260_v13 }
 0x2f3   :  { %435 = vpush %v262_v15 }
 0x324   :  { %s436_s5 = spop %435 }
 0x325   :  { %s266_s27 = smul.f32 0.0625, %s436_s5 }
 0x327   :  { %268 = sst [smem:[#allocation2]] %s266_s27 }
 0x328   :  { %389 = dma.smem_to_hbm %s472_s28, 16, %s588_s8, [#allocation3]  }
 0x32f   :  { %v371_v16 = vpop.permute.xlu1 %370 }
 0x330   :  { %374 = vst.msk [vmem:[%s587_s7] sm:$0x3] %vm373_vm9, %v371_v16 }
 0x331   :  { %379 = vst.msk [vmem:[%s587_s7] sm:$0x3] %vm378_vm10, %v376_v17 }
 0x332   :  { %466 = dma.done.wait [#allocation3], 16  }
 0x333   :  { %467 = vsyncadd [#allocation3], 4294967280 }
 0x334   :  { %395 = sfence }
 0x335   :  { %396 = vsyncpa [#allocation3], 1 }

</bundles_post_ra>
